<compile_context>
chip_gen: v7x
topology: tpu7x:2x2x1
jax: 0.10.0
libtpu: 0.0.40
codegen_flags: <defaults>
</compile_context>

<pallas_src>
import functools

import jax
import jax.numpy as jnp
from jax import lax
from jax.experimental import pallas as pl
from jax.experimental.pallas import tpu as pltpu

_BLOCK_BYTES = 4 * 1024 * 1024     # ~4 MiB per block
_VMEM_LIMIT = 32 * 1024 * 1024     # safe on v5e/v6e/v7x; >= 2x (in+out double-buffered)
_THRESH_BITS = 24                  # Bernoulli threshold resolution (2^-24 quantization)

_M1 = 0x85EBCA6B
_M2 = 0xC2B2AE35
_GOLDEN = 0x9E3779B9


def _round_up(v, m):
    return (v + m - 1) // m * m


def _mix_hash(seed_u32, *parts):
    """Murmur3-style avalanche of (seed, parts...) -> uint32 array (broadcasting)."""
    h = seed_u32 ^ jnp.uint32(_GOLDEN)
    for p in parts:
        h = (h + p) * jnp.uint32(_M1)
        h = h ^ (h >> jnp.uint32(15))
    # final avalanche
    h = h ^ (h >> jnp.uint32(16))
    h = h * jnp.uint32(_M1)
    h = h ^ (h >> jnp.uint32(13))
    h = h * jnp.uint32(_M2)
    h = h ^ (h >> jnp.uint32(16))
    return h


def _keep_mask(h, keep_thresh):
    """Low 24 bits of the hash compared against the keep threshold (bool array)."""
    low = lax.convert_element_type(h & jnp.uint32((1 << _THRESH_BITS) - 1), jnp.int32)
    return low < keep_thresh


def _dropout_kernel(seed_ref, x_ref, o_ref, *, keep_thresh, inv_keep, tie):
    """One (row_tile, col_tile) block: in-kernel hash mask, scale, store."""
    i = pl.program_id(0)                               # row block (batch*dim rows)
    j = pl.program_id(1)                               # col block (length positions)
    rt, ct = x_ref.shape

    seed = seed_ref[0].astype(jnp.uint32)
    row_ids = (i * rt + lax.broadcasted_iota(jnp.int32, (rt, 1), 0)).astype(jnp.uint32)

    x = x_ref[...]
    inv = jnp.asarray(inv_keep, dtype=x.dtype)

    if tie:
        # Mask depends only on (seed, global row) -> identical for every column
        # block of the same rows; (rt, 1) scale broadcast across lanes.
        keep = _keep_mask(_mix_hash(seed, row_ids), keep_thresh)          # (rt, 1)
        scale = jnp.where(keep, inv, jnp.zeros_like(inv))                 # (rt, 1)
        o_ref[...] = x * scale
    else:
        # Independent per-element mask from (seed, global row, global col).
        col_ids = (j * ct + lax.broadcasted_iota(jnp.int32, (1, ct), 1)).astype(jnp.uint32)
        keep = _keep_mask(_mix_hash(seed, row_ids, col_ids), keep_thresh)  # (rt, ct)
        o_ref[...] = jnp.where(keep, x * inv, jnp.zeros_like(x))


def _pick_tiles(rows, cols, itemsize):
    """Lane-dense, ~4 MiB blocks; ensure >=2 blocks on a parallel axis when possible."""
    row_tile = min(512, _round_up(rows, 8))
    lane_budget = max(128, (_BLOCK_BYTES // (row_tile * itemsize)) // 128 * 128)
    col_tile = min(lane_budget, _round_up(cols, 128))
    if pl.cdiv(rows, row_tile) == 1 and pl.cdiv(cols, col_tile) == 1:
        if rows > 8:
            row_tile = _round_up(-(-rows // 2), 8)
        elif cols > 128:
            col_tile = _round_up(-(-cols // 2), 128)
    return row_tile, col_tile


def dropout_nd(x, seed, *, p=0.5, tie=True, training=True):
    """Pallas-TPU DropoutNd forward.  x: (batch, dim, lengths...)."""
    if p < 0 or p >= 1:
        raise ValueError(f"dropout probability has to be in [0, 1), got {p}")
    if not training or p == 0.0:
        return x

    keep_prob = 1.0 - p
    keep_thresh = int(round(keep_prob * (1 << _THRESH_BITS)))
    inv_keep = 1.0 / keep_prob

    orig_shape = x.shape
    rows = int(orig_shape[0]) * int(orig_shape[1])
    cols = 1
    for d in orig_shape[2:]:
        cols *= int(d)
    x2 = x.reshape(rows, cols)

    itemsize = jnp.dtype(x.dtype).itemsize
    row_tile, col_tile = _pick_tiles(rows, cols, itemsize)
    grid = (pl.cdiv(rows, row_tile), pl.cdiv(cols, col_tile))

    seed_arr = jnp.asarray(seed, jnp.int32).reshape(1)

    kernel = functools.partial(
        _dropout_kernel, keep_thresh=keep_thresh, inv_keep=inv_keep, tie=tie)

    out = pl.pallas_call(
        kernel,
        out_shape=jax.ShapeDtypeStruct((rows, cols), x.dtype),
        grid_spec=pltpu.PrefetchScalarGridSpec(
            num_scalar_prefetch=1,
            grid=grid,
            in_specs=[pl.BlockSpec((row_tile, col_tile), lambda i, j, s: (i, j))],
            out_specs=pl.BlockSpec((row_tile, col_tile), lambda i, j, s: (i, j)),
        ),
        compiler_params=pltpu.CompilerParams(
            dimension_semantics=("parallel", "parallel"),
            vmem_limit_bytes=_VMEM_LIMIT),
        cost_estimate=pl.CostEstimate(
            flops=3 * rows * cols,
            transcendentals=0,
            bytes_accessed=2 * rows * cols * itemsize),
    )(seed_arr, x2)

    return out.reshape(orig_shape)


if __name__ == "__main__":
    key = jax.random.PRNGKey(0)
    k_x, k_big = jax.random.split(key, 2)

    p = 0.5
    scale = 1.0 / (1.0 - p)
    n, c, h, w = 2, 4, 16, 16
    x = jax.random.normal(k_x, (n, c, h, w), jnp.float32)
    seed = jnp.asarray(1234, jnp.int32)

    fwd = jax.jit(dropout_nd, static_argnames=("p", "tie", "training"))

    # --- training, tied (Dropout2d-style) ---------------------------------
    out = jax.block_until_ready(fwd(x, seed, p=p, tie=True, training=True))
    assert out.shape == x.shape and out.dtype == x.dtype

    kept = jnp.isclose(out, scale * x, atol=1e-6)
    dropped = (out == 0.0)
    assert bool(jnp.all(kept | dropped)), "values must be 0 or x/(1-p)"

    # Tie: every (batch, dim) row is entirely kept or entirely dropped.
    o2 = out.reshape(n * c, -1)
    x2 = x.reshape(n * c, -1)
    row_kept = jnp.all(jnp.isclose(o2, scale * x2, atol=1e-6), axis=1)
    row_drop = jnp.all(o2 == 0.0, axis=1)
    assert bool(jnp.all(row_kept | row_drop)), "mask must be tied per (batch, dim)"

    # Deterministic for a fixed seed.
    out2 = jax.block_until_ready(fwd(x, seed, p=p, tie=True, training=True))
    assert bool(jnp.array_equal(out, out2))

    # --- eval mode is the identity ----------------------------------------
    out_eval = jax.block_until_ready(fwd(x, seed, p=p, tie=True, training=False))
    assert bool(jnp.array_equal(out_eval, x))

    # --- statistical keep-rate check on a larger tensor (1024 tied rows) ---
    xb = jax.random.normal(k_big, (4, 256, 8, 32), jnp.float32)
    ob = jax.block_until_ready(fwd(xb, seed, p=p, tie=True, training=True))
    rows_alive = jnp.any(ob.reshape(4 * 256, -1) != 0.0, axis=1)
    frac = float(jnp.mean(rows_alive.astype(jnp.float32)))
    assert 0.35 < frac < 0.65, f"tied keep fraction {frac} far from {1 - p}"
    ob_s2 = jax.block_until_ready(fwd(xb, seed + 1, p=p, tie=True, training=True))
    assert not bool(jnp.array_equal(ob, ob_s2)), "different seeds must differ"

    # --- untied (element-wise) path ----------------------------------------
    ou = jax.block_until_ready(fwd(x, seed, p=p, tie=False, training=True))
    keptu = jnp.isclose(ou, scale * x, atol=1e-6)
    assert bool(jnp.all(keptu | (ou == 0.0)))
    fracu = float(jnp.mean((ou != 0.0).astype(jnp.float32)))
    assert 0.35 < fracu < 0.65, f"element keep fraction {fracu} far from {1 - p}"

    print("KERNEL_OK")
</pallas_src>

<mosaic_0001>
module attributes {stable_mosaic.version = 11 : i64} {
  func.func @_dropout_kernel(%arg0: i32, %arg1: i32, %arg2: memref<1xi32, #tpu.memory_space<smem>>, %arg3: memref<8x128xf32, #tpu.memory_space<vmem>>, %arg4: memref<8x128xf32, #tpu.memory_space<vmem>>) attributes {dimension_semantics = [#tpu.dimension_semantics<parallel>, #tpu.dimension_semantics<parallel>], iteration_bounds = array<i64: 1, 2>, scalar_prefetch = 1 : i64, scratch_operands = 0 : i64, tpu.core_type = #tpu.core_type<tc>, window_params = [{transform_indices = @transform_0, window_bounds = array<i64: 8, 128>}, {transform_indices = @transform_1, window_bounds = array<i64: 8, 128>}]} {
    %c0 = arith.constant 0 : index
    %0 = memref.load %arg2[%c0] : memref<1xi32, #tpu.memory_space<smem>>
    %c8_i32 = arith.constant 8 : i32
    %1 = arith.muli %arg0, %c8_i32 : i32
    %2 = tpu.iota {dimensions = array<i32: 0>} : vector<8x1xi32>
    %3 = vector.broadcast %1 : i32 to vector<8x1xi32>
    %4 = arith.addi %3, %2 : vector<8x1xi32>
    %c0_0 = arith.constant 0 : index
    %c0_1 = arith.constant 0 : index
    %5 = vector.load %arg3[%c0_0, %c0_1] : memref<8x128xf32, #tpu.memory_space<vmem>>, vector<8x128xf32>
    %c-1640531527_i32 = arith.constant -1640531527 : i32
    %6 = arith.xori %0, %c-1640531527_i32 : i32
    %7 = vector.broadcast %6 : i32 to vector<8x1xi32>
    %8 = arith.addi %7, %4 : vector<8x1xi32>
    %c-2048144789_i32 = arith.constant -2048144789 : i32
    %9 = vector.broadcast %c-2048144789_i32 : i32 to vector<8x1xi32>
    %10 = arith.muli %8, %9 : vector<8x1xi32>
    %c15_i32 = arith.constant 15 : i32
    %11 = vector.broadcast %c15_i32 : i32 to vector<8x1xi32>
    %12 = arith.shrui %10, %11 : vector<8x1xi32>
    %13 = arith.xori %10, %12 : vector<8x1xi32>
    %c16_i32 = arith.constant 16 : i32
    %14 = vector.broadcast %c16_i32 : i32 to vector<8x1xi32>
    %15 = arith.shrui %13, %14 : vector<8x1xi32>
    %16 = arith.xori %13, %15 : vector<8x1xi32>
    %c-2048144789_i32_2 = arith.constant -2048144789 : i32
    %17 = vector.broadcast %c-2048144789_i32_2 : i32 to vector<8x1xi32>
    %18 = arith.muli %16, %17 : vector<8x1xi32>
    %c13_i32 = arith.constant 13 : i32
    %19 = vector.broadcast %c13_i32 : i32 to vector<8x1xi32>
    %20 = arith.shrui %18, %19 : vector<8x1xi32>
    %21 = arith.xori %18, %20 : vector<8x1xi32>
    %c-1028477387_i32 = arith.constant -1028477387 : i32
    %22 = vector.broadcast %c-1028477387_i32 : i32 to vector<8x1xi32>
    %23 = arith.muli %21, %22 : vector<8x1xi32>
    %c16_i32_3 = arith.constant 16 : i32
    %24 = vector.broadcast %c16_i32_3 : i32 to vector<8x1xi32>
    %25 = arith.shrui %23, %24 : vector<8x1xi32>
    %26 = arith.xori %23, %25 : vector<8x1xi32>
    %c16777215_i32 = arith.constant 16777215 : i32
    %27 = vector.broadcast %c16777215_i32 : i32 to vector<8x1xi32>
    %28 = arith.andi %26, %27 : vector<8x1xi32>
    %c8388608_i32 = arith.constant 8388608 : i32
    %29 = vector.broadcast %c8388608_i32 : i32 to vector<8x1xi32>
    %30 = arith.cmpi slt, %28, %29 : vector<8x1xi32>
    %cst = arith.constant 2.000000e+00 : f32
    %cst_4 = arith.constant 0.000000e+00 : f32
    %31 = vector.broadcast %cst : f32 to vector<8x1xf32>
    %32 = vector.broadcast %cst_4 : f32 to vector<8x1xf32>
    %33 = arith.select %30, %31, %32 : vector<8x1xi1>, vector<8x1xf32>
    %34 = vector.broadcast %33 : vector<8x1xf32> to vector<8x128xf32>
    %35 = arith.mulf %5, %34 : vector<8x128xf32>
    %c0_5 = arith.constant 0 : index
    %c0_6 = arith.constant 0 : index
    %36 = vector.load %arg4[%c0_5, %c0_6] : memref<8x128xf32, #tpu.memory_space<vmem>>, vector<8x128xf32>
    tpu.vector_store %arg4[%c0_5, %c0_6], %35 {strides = array<i32>} : memref<8x128xf32, #tpu.memory_space<vmem>>, vector<8x128xf32>,
    return
  }
  func.func @transform_0(%arg0: i32, %arg1: i32, %arg2: memref<1xi32, #tpu.memory_space<smem>>) -> (i32, i32) {
    %c0_i32 = arith.constant 0 : i32
    return %arg0, %arg1 : i32, i32
  }
  func.func @transform_1(%arg0: i32, %arg1: i32, %arg2: memref<1xi32, #tpu.memory_space<smem>>) -> (i32, i32) {
    %c0_i32 = arith.constant 0 : i32
    return %arg0, %arg1 : i32, i32
  }
}

</mosaic_0001>

<bundles_post_ra>
// kernel: dropout_nd.1
= control target key start
LH: loop header
LB: loop body
LE: loop exit
PB: predicated region body
PF: predicated region fallthrough
CT: control target
= control target key end

     0   :  { %s336_s11 = smov 0   ;;  %s338_s12 = smov 0   ;;  %s369_s0 = inlined_call_operand.<no memory space> [shape: s32[1], index: 0, kind: input, shape index: {}]   ;;  %s370_s1 = inlined_call_operand.vmem [shape: f32[8,256], index: 1, kind: input, shape index: {}]   ;;  %s371_s2 = inlined_call_operand.vmem [shape: f32[8,256], index: 2, kind: output, shape index: {}]  }
   0x1   :  { %7 = sst [smem:[#allocation3]] %s369_s0  ;;  %s340_s13 = smov 0  }
   0x2 LB: > { %s22_s0 = sadd.s32 1, %s311_s12  ;;  %p263_p0 = scmp.ge.s32.totalorder %s315_s13, 1  ;;  %s315_s13 = sphi %s340_s13, %s13_s13   ;;  %s311_s12 = sphi %s338_s12, %s373_s12   ;;  %s307_s11 = sphi %s336_s11, %s372_s11  }
   0x3   : > { %p23_p1 = scmp.ge.s32.totalorder %s22_s0, 2  ;;  %p108_p2 = scmp.lt.s32.totalorder %s315_s13, 3 }
   0x5   : > { %s375_s0 = smov (%p23_p1, %s22_s0), 0  ;;  %p109_p3 = pnand %p263_p0, %p108_p2 }
   0x6   : > { %s150_s14 = sld [smem:[#allocation3]] (!%p109_p3)  ;;  %v152_v0 = vlaneseq (!%p109_p3)  ;;  %p136_p4 = scmp.lt.s32.totalorder (!%p109_p3), %s307_s11, 1  ;;  %v317_v17 = vmov (!%p109_p3), 0.0  }
   0x7   : > { %112 = sbr.rel (%p109_p3) target bundleno = 45 (0x2d), region = 24 }
   0x8   : > { %v153_v1 = vshrl.u32 (!%p109_p3), %v152_v0, 7 }
   0xc   : > { %s157_s15 = sxor.u32 (!%p109_p3), 2654435769, %s150_s14 }
   0xd   : > { %v158_v2 = vstv (!%p109_p3), %s157_s15 }
   0xe   : > { %v159_v3 = vadd.s32 %v158_v2, %v153_v1  ;;  %s377_s11 = smov (!%p136_p4, %s307_s11), 1 }
   0xf   : > { %s264_s16 = sshll.u32 %s377_s11, 3 }
  0x10   : > { %v160_v4 = vmul.u32 2246822507, %v159_v3  ;;  %s141_s19 = scalar_lea.vmem %s370_s1, %s264_s16  ;;  %s149_s22 = scalar_lea.vmem %s371_s2, %s264_s16 }
  0x11   : > { %v156_v16 = vld [vmem:[%s141_s19] sm:$0xff] }
  0x12   : > { %v161_v5 = vshrl.u32 %v160_v4, 15 }
  0x14   : > { %v162_v6 = vxor.u32 %v161_v5, %v160_v4 }
  0x16   : > { %v163_v7 = vshrl.u32 %v162_v6, 16 }
  0x18   : > { %v164_v8 = vxor.u32 %v163_v7, %v162_v6 }
  0x1a   : > { %v165_v9 = vmul.u32 2246822507, %v164_v8 }
  0x1c   : > { %v166_v10 = vshrl.u32 %v165_v9, 13 }
  0x1e   : > { %v167_v11 = vxor.u32 %v166_v10, %v165_v9 }
  0x20   : > { %v168_v12 = vmul.u32 3266489909, %v167_v11 }
  0x22   : > { %v169_v13 = vshrl.u32 %v168_v12, 16 }
  0x24   : > { %v170_v14 = vxor.u32 %v169_v13, %v168_v12 }
  0x26   : > { %v171_v15 = vand.u32 16777215, %v170_v14 }
  0x28   : > { %vm172_vm0 = vcmp.lt.s32.totalorder %v171_v15, 8388608 }
  0x29   : > { %v173_v18 = vsel %vm172_vm0, 2.0, %v317_v17 }
  0x2a   : > { %v174_v19 = vmul.f32 %v173_v18, %v156_v16 }
  0x2c   : > { %175 = vst [vmem:[%s149_s22] sm:$0xff] %v174_v19 }
  0x2d PF: > { %s13_s13 = sadd.s32 1, %s315_s13   ;;  %s372_s11 = smov %s311_s12 }
  0x2e   : > { %p10_p5 = scmp.ge.s32.totalorder %s13_s13, 4   ;;  %s373_s12 = smov %s375_s0 }
  0x30   :  { %12 = sbr.rel (!%p10_p5) target bundleno = 2 (0x2), region = 54 }

</bundles_post_ra>
